<compile_context>
chip_gen: v7x
topology: tpu7x:2x2x1
jax: 0.10.0
libtpu: 0.0.40
codegen_flags: <defaults>
</compile_context>

<pallas_src>
import functools

import numpy as np
import jax
import jax.numpy as jnp
from jax.experimental import pallas as pl
from jax.experimental.pallas import tpu as pltpu


# ----------------------------------------------------------------------------
# Constant matrices (built once with numpy, constant-folded under jit)
# ----------------------------------------------------------------------------
@functools.lru_cache(maxsize=None)
def _conv_pool_constants(B, H, W, pool_out=4):
    """Boundary masks for the 9 conv taps and the avg-pool matrix.

    masks[k, b*H*W + h*W + w] = 1 iff (h+dh, w+dw) is inside the image, k=(dh+1)*3+(dw+1)
    pool [b*H*W + h*W + w, b*16 + (h//sh)*4 + (w//sw)] = 1/(sh*sw)  (block-diag over b)
    """
    HW = H * W
    sh, sw = H // pool_out, W // pool_out
    masks = np.zeros((9, B * HW), np.float32)
    pool = np.zeros((B * HW, B * pool_out * pool_out), np.float32)
    for b in range(B):
        for h in range(H):
            for w in range(W):
                j = b * HW + h * W + w
                m = b * pool_out * pool_out + (h // sh) * pool_out + (w // sw)
                pool[j, m] = 1.0 / float(sh * sw)
                for k in range(9):
                    dh, dw = k // 3 - 1, k % 3 - 1
                    if 0 <= h + dh < H and 0 <= w + dw < W:
                        masks[k, j] = 1.0
    return masks, pool


# ----------------------------------------------------------------------------
# Fused Pallas kernel: conv3x3(pad=1) + ReLU + avgpool(4x4) + flatten + projector MLP
# ----------------------------------------------------------------------------
def _fused_forward_kernel(x_ref, mask_ref, pool_ref, cw_ref, cb_ref,
                          w1_ref, b1_ref, g_ref, beta_ref, w2_ref, b2_ref,
                          proj_ref, rep_ref, *, B, C, W, pool_out):
    c_out = cw_ref.shape[0]
    S = pool_out * pool_out

    # x2[b*C + c, h*W + w] -> xb[c, b*HW + h*W + w]   (lane-aligned concat, no reshape)
    x2 = x_ref[...]
    HW = x2.shape[1]
    N = B * HW
    xb = jnp.concatenate([x2[b * C:(b + 1) * C, :] for b in range(B)], axis=1)  # (C, N)

    # In-kernel im2col: each of the 9 taps is one XLU lane-rotation of xb plus a
    # per-tap boundary mask.  rolled[:, j] = xb[:, (j+delta) % N]; every wrapped or
    # cross-image column has mask 0, so the rotation is exact for in-image taps.
    masks = mask_ref[...]                                     # (9, N)
    slabs = []
    for k in range(9):
        dh, dw = k // 3 - 1, k % 3 - 1
        delta = dh * W + dw                                   # flat column shift
        if delta == 0:
            slabs.append(xb)                                  # center tap: always valid
        else:
            rolled = pltpu.roll(xb, (-delta) % N, axis=1)
            slabs.append(rolled * masks[k:k + 1, :])          # zero out-of-image taps
    patches = jnp.concatenate(slabs, axis=0)                  # (9*C, N)

    # Conv + bias + ReLU, lane-dense (c_out, N) output on the MXU.
    a = jnp.dot(cw_ref[...], patches, preferred_element_type=jnp.float32)
    a = jnp.maximum(a + cb_ref[...], 0.0)                     # (c_out, N)

    # AdaptiveAvgPool2d((4,4)) as a single matmul with a constant averaging matrix.
    pooled = jnp.dot(a, pool_ref[...], preferred_element_type=jnp.float32)  # (c_out, B*S)

    # Flatten in NCHW order: rep[b, c*S + s] = pooled[c, b*S + s]
    # TODO(synk): this tiny (8,16)->(1,128) sublane->lane transpose per batch has no
    # matmul-free lane-dense formulation; at 256 floats it is negligible.
    rows = []
    for b in range(B):
        rows.append(jnp.concatenate(
            [pooled[c:c + 1, b * S:(b + 1) * S] for c in range(c_out)], axis=1))
    rep = jnp.concatenate(rows, axis=0)                       # (B, c_out*S)
    rep_ref[...] = rep

    # Projector MLP: Linear -> BatchNorm1d (biased batch stats, train) -> ReLU -> Linear
    h = jnp.dot(rep, w1_ref[...], preferred_element_type=jnp.float32) + b1_ref[...]
    mean = jnp.mean(h, axis=0, keepdims=True)
    var = jnp.mean((h - mean) ** 2, axis=0, keepdims=True)
    hn = (h - mean) * jax.lax.rsqrt(var + 1e-5)
    hn = jnp.maximum(hn * g_ref[...] + beta_ref[...], 0.0)
    proj = jnp.dot(hn, w2_ref[...], preferred_element_type=jnp.float32) + b2_ref[...]
    proj_ref[...] = proj


def _full_spec(shape):
    # Whole array as a single block (block dims == array dims satisfies TPU rules).
    return pl.BlockSpec(shape, lambda: tuple(0 for _ in shape))


def fused_netwrapper_pallas(x2, masks, pool, params, *, B, C, W, pool_out=4):
    c_out = params["conv_w"].shape[0]
    hid = params["w1"].shape[1]
    rep_dim = c_out * pool_out * pool_out
    proj_dim = params["w2"].shape[1]
    N = x2.shape[0] // C * x2.shape[1]        # B*HW

    kernel = functools.partial(_fused_forward_kernel, B=B, C=C, W=W, pool_out=pool_out)
    operands = (x2, masks, pool,
                params["conv_w"], params["conv_b"],
                params["w1"], params["b1"],
                params["bn_gamma"], params["bn_beta"],
                params["w2"], params["b2"])

    flops = 2 * (c_out * 9 * C * N          # conv matmul
                 + c_out * N * B * pool_out * pool_out   # pooling matmul
                 + B * rep_dim * hid        # projector fc1
                 + B * hid * proj_dim)      # projector fc2
    bytes_accessed = 4 * (sum(int(np.prod(o.shape)) for o in operands)
                          + B * proj_dim + B * rep_dim)
    cost = pl.CostEstimate(flops=flops, transcendentals=hid, bytes_accessed=bytes_accessed)

    return pl.pallas_call(
        kernel,
        out_shape=(jax.ShapeDtypeStruct((B, proj_dim), jnp.float32),
                   jax.ShapeDtypeStruct((B, rep_dim), jnp.float32)),
        in_specs=[_full_spec(o.shape) for o in operands],
        out_specs=(_full_spec((B, proj_dim)), _full_spec((B, rep_dim))),
        cost_estimate=cost,
    )(*operands)


# ----------------------------------------------------------------------------
# Parameters & forward
# ----------------------------------------------------------------------------
def _uniform(key, shape, bound):
    return jax.random.uniform(key, shape, jnp.float32, -bound, bound)


def init_params(key, c_in=4, c_out=8, proj_in=128, proj_hidden=64, proj_out=32):
    ks = jax.random.split(key, 6)
    fan_conv = c_in * 9
    bound_c = 1.0 / float(np.sqrt(fan_conv))
    # Conv weight created in PyTorch layout (O, C, 3, 3), then pre-arranged to match the
    # in-kernel patch row order (kh*3+kw major, c minor): conv_w[o, (kh*3+kw)*C + c].
    w_pt = _uniform(ks[0], (c_out, c_in, 3, 3), bound_c)
    conv_w = jnp.transpose(w_pt, (0, 2, 3, 1)).reshape(c_out, 9 * c_in)
    return {
        "conv_w": conv_w,                                    # (c_out, 9*C)
        "conv_b": _uniform(ks[1], (c_out, 1), bound_c),      # (c_out, 1)
        # projector Linear1: PyTorch (H, D) stored transposed as (D, H)
        "w1": _uniform(ks[2], (proj_in, proj_hidden), 1.0 / float(np.sqrt(proj_in))),
        "b1": _uniform(ks[3], (1, proj_hidden), 1.0 / float(np.sqrt(proj_in))),
        "bn_gamma": jnp.ones((1, proj_hidden), jnp.float32),
        "bn_beta": jnp.zeros((1, proj_hidden), jnp.float32),
        # projector Linear2: PyTorch (P, H) stored transposed as (H, P)
        "w2": _uniform(ks[4], (proj_hidden, proj_out), 1.0 / float(np.sqrt(proj_hidden))),
        "b2": _uniform(ks[5], (1, proj_out), 1.0 / float(np.sqrt(proj_hidden))),
    }


@functools.partial(jax.jit, static_argnames=("return_projection",))
def netwrapper_forward(x, params, return_projection=True):
    """x: (B, C, H, W) NCHW float32.  Returns (projection, representation)."""
    B, C, H, W = x.shape
    # Only XLA op outside the fused kernel: a contiguous (bitcast) reshape of the input.
    x2 = x.reshape(B * C, H * W)
    masks_np, pool_np = _conv_pool_constants(B, H, W)
    projection, representation = fused_netwrapper_pallas(
        x2, jnp.asarray(masks_np), jnp.asarray(pool_np), params, B=B, C=C, W=W)
    if not return_projection:
        return representation
    return projection, representation


if __name__ == "__main__":
    key = jax.random.PRNGKey(0)
    k_x, k_p = jax.random.split(key)

    B, C, H, W = 2, 4, 16, 16
    x = jax.random.normal(k_x, (B, C, H, W), jnp.float32)

    params = init_params(k_p, c_in=C, c_out=8,
                         proj_in=8 * 4 * 4, proj_hidden=64, proj_out=32)

    projection, representation = netwrapper_forward(x, params)
    jax.block_until_ready((projection, representation))

    assert projection.shape == (B, 32), projection.shape
    assert representation.shape == (B, 128), representation.shape
    assert bool(jnp.all(jnp.isfinite(projection)))
    assert bool(jnp.all(jnp.isfinite(representation)))

    print("KERNEL_OK")
</pallas_src>

<mosaic_0001>
module attributes {stable_mosaic.version = 11 : i64} {
  func.func @_fused_forward_kernel(%arg0: memref<8x256xf32, #tpu.memory_space<vmem>>, %arg1: memref<9x512xf32, #tpu.memory_space<vmem>>, %arg2: memref<512x32xf32, #tpu.memory_space<vmem>>, %arg3: memref<8x36xf32, #tpu.memory_space<vmem>>, %arg4: memref<8x1xf32, #tpu.memory_space<vmem>>, %arg5: memref<128x64xf32, #tpu.memory_space<vmem>>, %arg6: memref<1x64xf32, #tpu.memory_space<vmem>>, %arg7: memref<1x64xf32, #tpu.memory_space<vmem>>, %arg8: memref<1x64xf32, #tpu.memory_space<vmem>>, %arg9: memref<64x32xf32, #tpu.memory_space<vmem>>, %arg10: memref<1x32xf32, #tpu.memory_space<vmem>>, %arg11: memref<2x32xf32, #tpu.memory_space<vmem>>, %arg12: memref<2x128xf32, #tpu.memory_space<vmem>>) attributes {dimension_semantics = [], scalar_prefetch = 0 : i64, scratch_operands = 0 : i64, tpu.core_type = #tpu.core_type<tc>} {
    %c0 = arith.constant 0 : index
    %c0_0 = arith.constant 0 : index
    %0 = vector.load %arg0[%c0, %c0_0] : memref<8x256xf32, #tpu.memory_space<vmem>>, vector<8x256xf32>
    %1 = vector.extract_strided_slice %0 {offsets = [0, 0], sizes = [4, 256], strides = [1, 1]} : vector<8x256xf32> to vector<4x256xf32>
    %2 = vector.extract_strided_slice %0 {offsets = [4, 0], sizes = [4, 256], strides = [1, 1]} : vector<8x256xf32> to vector<4x256xf32>
    %3 = tpu.concatenate %1, %2 in 1 : vector<4x256xf32>, vector<4x256xf32> -> vector<4x512xf32>
    %c0_1 = arith.constant 0 : index
    %c0_2 = arith.constant 0 : index
    %4 = vector.load %arg1[%c0_1, %c0_2] : memref<9x512xf32, #tpu.memory_space<vmem>>, vector<9x512xf32>
    %c17_i32 = arith.constant 17 : i32
    %5 = tpu.dynamic_rotate %3 by %c17_i32 dim 1 : vector<4x512xf32>, i32 -> vector<4x512xf32>
    %6 = vector.extract_strided_slice %4 {offsets = [0, 0], sizes = [1, 512], strides = [1, 1]} : vector<9x512xf32> to vector<1x512xf32>
    %7 = vector.broadcast %6 : vector<1x512xf32> to vector<4x512xf32>
    %8 = arith.mulf %5, %7 : vector<4x512xf32>
    %c16_i32 = arith.constant 16 : i32
    %9 = tpu.dynamic_rotate %3 by %c16_i32 dim 1 : vector<4x512xf32>, i32 -> vector<4x512xf32>
    %10 = vector.extract_strided_slice %4 {offsets = [1, 0], sizes = [1, 512], strides = [1, 1]} : vector<9x512xf32> to vector<1x512xf32>
    %11 = vector.broadcast %10 : vector<1x512xf32> to vector<4x512xf32>
    %12 = arith.mulf %9, %11 : vector<4x512xf32>
    %c15_i32 = arith.constant 15 : i32
    %13 = tpu.dynamic_rotate %3 by %c15_i32 dim 1 : vector<4x512xf32>, i32 -> vector<4x512xf32>
    %14 = vector.extract_strided_slice %4 {offsets = [2, 0], sizes = [1, 512], strides = [1, 1]} : vector<9x512xf32> to vector<1x512xf32>
    %15 = vector.broadcast %14 : vector<1x512xf32> to vector<4x512xf32>
    %16 = arith.mulf %13, %15 : vector<4x512xf32>
    %c1_i32 = arith.constant 1 : i32
    %17 = tpu.dynamic_rotate %3 by %c1_i32 dim 1 : vector<4x512xf32>, i32 -> vector<4x512xf32>
    %18 = vector.extract_strided_slice %4 {offsets = [3, 0], sizes = [1, 512], strides = [1, 1]} : vector<9x512xf32> to vector<1x512xf32>
    %19 = vector.broadcast %18 : vector<1x512xf32> to vector<4x512xf32>
    %20 = arith.mulf %17, %19 : vector<4x512xf32>
    %c511_i32 = arith.constant 511 : i32
    %21 = tpu.dynamic_rotate %3 by %c511_i32 dim 1 : vector<4x512xf32>, i32 -> vector<4x512xf32>
    %22 = vector.extract_strided_slice %4 {offsets = [5, 0], sizes = [1, 512], strides = [1, 1]} : vector<9x512xf32> to vector<1x512xf32>
    %23 = vector.broadcast %22 : vector<1x512xf32> to vector<4x512xf32>
    %24 = arith.mulf %21, %23 : vector<4x512xf32>
    %c497_i32 = arith.constant 497 : i32
    %25 = tpu.dynamic_rotate %3 by %c497_i32 dim 1 : vector<4x512xf32>, i32 -> vector<4x512xf32>
    %26 = vector.extract_strided_slice %4 {offsets = [6, 0], sizes = [1, 512], strides = [1, 1]} : vector<9x512xf32> to vector<1x512xf32>
    %27 = vector.broadcast %26 : vector<1x512xf32> to vector<4x512xf32>
    %28 = arith.mulf %25, %27 : vector<4x512xf32>
    %c496_i32 = arith.constant 496 : i32
    %29 = tpu.dynamic_rotate %3 by %c496_i32 dim 1 : vector<4x512xf32>, i32 -> vector<4x512xf32>
    %30 = vector.extract_strided_slice %4 {offsets = [7, 0], sizes = [1, 512], strides = [1, 1]} : vector<9x512xf32> to vector<1x512xf32>
    %31 = vector.broadcast %30 : vector<1x512xf32> to vector<4x512xf32>
    %32 = arith.mulf %29, %31 : vector<4x512xf32>
    %c495_i32 = arith.constant 495 : i32
    %33 = tpu.dynamic_rotate %3 by %c495_i32 dim 1 : vector<4x512xf32>, i32 -> vector<4x512xf32>
    %34 = vector.extract_strided_slice %4 {offsets = [8, 0], sizes = [1, 512], strides = [1, 1]} : vector<9x512xf32> to vector<1x512xf32>
    %35 = vector.broadcast %34 : vector<1x512xf32> to vector<4x512xf32>
    %36 = arith.mulf %33, %35 : vector<4x512xf32>
    %37 = tpu.concatenate %8, %12, %16, %20, %3, %24, %28, %32, %36 in 0 : vector<4x512xf32>, vector<4x512xf32>, vector<4x512xf32>, vector<4x512xf32>, vector<4x512xf32>, vector<4x512xf32>, vector<4x512xf32>, vector<4x512xf32>, vector<4x512xf32> -> vector<36x512xf32>
    %c0_3 = arith.constant 0 : index
    %c0_4 = arith.constant 0 : index
    %38 = vector.load %arg3[%c0_3, %c0_4] : memref<8x36xf32, #tpu.memory_space<vmem>>, vector<8x36xf32>
    %cst = arith.constant dense<0.000000e+00> : vector<8x512xf32>
    %39 = tpu.matmul %38, %37, %cst {dimension_numbers = #tpu.dot_dimension_numbers<[1], [0], [0], [1], [0, 0, 1, 1], [], []>} : vector<8x36xf32>, vector<36x512xf32>, vector<8x512xf32> -> vector<8x512xf32>
    %c0_5 = arith.constant 0 : index
    %c0_6 = arith.constant 0 : index
    %40 = vector.load %arg4[%c0_5, %c0_6] : memref<8x1xf32, #tpu.memory_space<vmem>>, vector<8x1xf32>
    %41 = vector.broadcast %40 : vector<8x1xf32> to vector<8x512xf32>
    %42 = arith.addf %39, %41 : vector<8x512xf32>
    %cst_7 = arith.constant 0.000000e+00 : f32
    %43 = vector.broadcast %cst_7 : f32 to vector<8x512xf32>
    %44 = arith.maximumf %42, %43 : vector<8x512xf32>
    %c0_8 = arith.constant 0 : index
    %c0_9 = arith.constant 0 : index
    %45 = vector.load %arg2[%c0_8, %c0_9] : memref<512x32xf32, #tpu.memory_space<vmem>>, vector<512x32xf32>
    %cst_10 = arith.constant dense<0.000000e+00> : vector<8x32xf32>
    %46 = tpu.matmul %44, %45, %cst_10 {dimension_numbers = #tpu.dot_dimension_numbers<[1], [0], [0], [1], [0, 0, 1, 1], [], []>} : vector<8x512xf32>, vector<512x32xf32>, vector<8x32xf32> -> vector<8x32xf32>
    %47 = vector.extract_strided_slice %46 {offsets = [0, 0], sizes = [1, 16], strides = [1, 1]} : vector<8x32xf32> to vector<1x16xf32>
    %48 = vector.extract_strided_slice %46 {offsets = [1, 0], sizes = [1, 16], strides = [1, 1]} : vector<8x32xf32> to vector<1x16xf32>
    %49 = vector.extract_strided_slice %46 {offsets = [2, 0], sizes = [1, 16], strides = [1, 1]} : vector<8x32xf32> to vector<1x16xf32>
    %50 = vector.extract_strided_slice %46 {offsets = [3, 0], sizes = [1, 16], strides = [1, 1]} : vector<8x32xf32> to vector<1x16xf32>
    %51 = vector.extract_strided_slice %46 {offsets = [4, 0], sizes = [1, 16], strides = [1, 1]} : vector<8x32xf32> to vector<1x16xf32>
    %52 = vector.extract_strided_slice %46 {offsets = [5, 0], sizes = [1, 16], strides = [1, 1]} : vector<8x32xf32> to vector<1x16xf32>
    %53 = vector.extract_strided_slice %46 {offsets = [6, 0], sizes = [1, 16], strides = [1, 1]} : vector<8x32xf32> to vector<1x16xf32>
    %54 = vector.extract_strided_slice %46 {offsets = [7, 0], sizes = [1, 16], strides = [1, 1]} : vector<8x32xf32> to vector<1x16xf32>
    %55 = tpu.concatenate %47, %48, %49, %50, %51, %52, %53, %54 in 1 : vector<1x16xf32>, vector<1x16xf32>, vector<1x16xf32>, vector<1x16xf32>, vector<1x16xf32>, vector<1x16xf32>, vector<1x16xf32>, vector<1x16xf32> -> vector<1x128xf32>
    %56 = vector.extract_strided_slice %46 {offsets = [0, 16], sizes = [1, 16], strides = [1, 1]} : vector<8x32xf32> to vector<1x16xf32>
    %57 = vector.extract_strided_slice %46 {offsets = [1, 16], sizes = [1, 16], strides = [1, 1]} : vector<8x32xf32> to vector<1x16xf32>
    %58 = vector.extract_strided_slice %46 {offsets = [2, 16], sizes = [1, 16], strides = [1, 1]} : vector<8x32xf32> to vector<1x16xf32>
    %59 = vector.extract_strided_slice %46 {offsets = [3, 16], sizes = [1, 16], strides = [1, 1]} : vector<8x32xf32> to vector<1x16xf32>
    %60 = vector.extract_strided_slice %46 {offsets = [4, 16], sizes = [1, 16], strides = [1, 1]} : vector<8x32xf32> to vector<1x16xf32>
    %61 = vector.extract_strided_slice %46 {offsets = [5, 16], sizes = [1, 16], strides = [1, 1]} : vector<8x32xf32> to vector<1x16xf32>
    %62 = vector.extract_strided_slice %46 {offsets = [6, 16], sizes = [1, 16], strides = [1, 1]} : vector<8x32xf32> to vector<1x16xf32>
    %63 = vector.extract_strided_slice %46 {offsets = [7, 16], sizes = [1, 16], strides = [1, 1]} : vector<8x32xf32> to vector<1x16xf32>
    %64 = tpu.concatenate %56, %57, %58, %59, %60, %61, %62, %63 in 1 : vector<1x16xf32>, vector<1x16xf32>, vector<1x16xf32>, vector<1x16xf32>, vector<1x16xf32>, vector<1x16xf32>, vector<1x16xf32>, vector<1x16xf32> -> vector<1x128xf32>
    %65 = tpu.concatenate %55, %64 in 0 : vector<1x128xf32>, vector<1x128xf32> -> vector<2x128xf32>
    %c0_11 = arith.constant 0 : index
    %c0_12 = arith.constant 0 : index
    %66 = vector.load %arg12[%c0_11, %c0_12] : memref<2x128xf32, #tpu.memory_space<vmem>>, vector<2x128xf32>
    tpu.vector_store %arg12[%c0_11, %c0_12], %65 {strides = array<i32>} : memref<2x128xf32, #tpu.memory_space<vmem>>, vector<2x128xf32>,
    %c0_13 = arith.constant 0 : index
    %c0_14 = arith.constant 0 : index
    %67 = vector.load %arg5[%c0_13, %c0_14] : memref<128x64xf32, #tpu.memory_space<vmem>>, vector<128x64xf32>
    %cst_15 = arith.constant dense<0.000000e+00> : vector<2x64xf32>
    %68 = tpu.matmul %65, %67, %cst_15 {dimension_numbers = #tpu.dot_dimension_numbers<[1], [0], [0], [1], [0, 0, 1, 1], [], []>} : vector<2x128xf32>, vector<128x64xf32>, vector<2x64xf32> -> vector<2x64xf32>
    %c0_16 = arith.constant 0 : index
    %c0_17 = arith.constant 0 : index
    %69 = vector.load %arg6[%c0_16, %c0_17] : memref<1x64xf32, #tpu.memory_space<vmem>>, vector<1x64xf32>
    %70 = vector.broadcast %69 : vector<1x64xf32> to vector<2x64xf32>
    %71 = arith.addf %68, %70 : vector<2x64xf32>
    %cst_18 = arith.constant dense<0.000000e+00> : vector<64xf32>
    %72 = vector.multi_reduction <add>, %71, %cst_18 [0] : vector<2x64xf32> to vector<64xf32>
    %73 = vector.shape_cast %72 : vector<64xf32> to vector<1x64xf32>
    %cst_19 = arith.constant 2.000000e+00 : f32
    %74 = vector.broadcast %cst_19 : f32 to vector<1x64xf32>
    %75 = arith.divf %73, %74 : vector<1x64xf32>
    %76 = vector.broadcast %75 : vector<1x64xf32> to vector<2x64xf32>
    %77 = arith.subf %71, %76 : vector<2x64xf32>
    %78 = arith.mulf %77, %77 : vector<2x64xf32>
    %cst_20 = arith.constant dense<0.000000e+00> : vector<64xf32>
    %79 = vector.multi_reduction <add>, %78, %cst_20 [0] : vector<2x64xf32> to vector<64xf32>
    %80 = vector.shape_cast %79 : vector<64xf32> to vector<1x64xf32>
    %cst_21 = arith.constant 2.000000e+00 : f32
    %81 = vector.broadcast %cst_21 : f32 to vector<1x64xf32>
    %82 = arith.divf %80, %81 : vector<1x64xf32>
    %83 = vector.broadcast %75 : vector<1x64xf32> to vector<2x64xf32>
    %84 = arith.subf %71, %83 : vector<2x64xf32>
    %cst_22 = arith.constant 9.99999974E-6 : f32
    %85 = vector.broadcast %cst_22 : f32 to vector<1x64xf32>
    %86 = arith.addf %82, %85 : vector<1x64xf32>
    %87 = math.rsqrt %86 : vector<1x64xf32>
    %88 = vector.broadcast %87 : vector<1x64xf32> to vector<2x64xf32>
    %89 = arith.mulf %84, %88 : vector<2x64xf32>
    %c0_23 = arith.constant 0 : index
    %c0_24 = arith.constant 0 : index
    %90 = vector.load %arg7[%c0_23, %c0_24] : memref<1x64xf32, #tpu.memory_space<vmem>>, vector<1x64xf32>
    %91 = vector.broadcast %90 : vector<1x64xf32> to vector<2x64xf32>
    %92 = arith.mulf %89, %91 : vector<2x64xf32>
    %c0_25 = arith.constant 0 : index
    %c0_26 = arith.constant 0 : index
    %93 = vector.load %arg8[%c0_25, %c0_26] : memref<1x64xf32, #tpu.memory_space<vmem>>, vector<1x64xf32>
    %94 = vector.broadcast %93 : vector<1x64xf32> to vector<2x64xf32>
    %95 = arith.addf %92, %94 : vector<2x64xf32>
    %cst_27 = arith.constant 0.000000e+00 : f32
    %96 = vector.broadcast %cst_27 : f32 to vector<2x64xf32>
    %97 = arith.maximumf %95, %96 : vector<2x64xf32>
    %c0_28 = arith.constant 0 : index
    %c0_29 = arith.constant 0 : index
    %98 = vector.load %arg9[%c0_28, %c0_29] : memref<64x32xf32, #tpu.memory_space<vmem>>, vector<64x32xf32>
    %cst_30 = arith.constant dense<0.000000e+00> : vector<2x32xf32>
    %99 = tpu.matmul %97, %98, %cst_30 {dimension_numbers = #tpu.dot_dimension_numbers<[1], [0], [0], [1], [0, 0, 1, 1], [], []>} : vector<2x64xf32>, vector<64x32xf32>, vector<2x32xf32> -> vector<2x32xf32>
    %c0_31 = arith.constant 0 : index
    %c0_32 = arith.constant 0 : index
    %100 = vector.load %arg10[%c0_31, %c0_32] : memref<1x32xf32, #tpu.memory_space<vmem>>, vector<1x32xf32>
    %101 = vector.broadcast %100 : vector<1x32xf32> to vector<2x32xf32>
    %102 = arith.addf %99, %101 : vector<2x32xf32>
    %c0_33 = arith.constant 0 : index
    %c0_34 = arith.constant 0 : index
    %103 = vector.load %arg11[%c0_33, %c0_34] : memref<2x32xf32, #tpu.memory_space<vmem>>, vector<2x32xf32>
    tpu.vector_store %arg11[%c0_33, %c0_34], %102 {strides = array<i32>} : memref<2x32xf32, #tpu.memory_space<vmem>>, vector<2x32xf32>,
    return
  }
}

</mosaic_0001>

<bundles_post_ra>
// kernel: netwrapper_forward.1
= control target key start
LH: loop header
LB: loop body
LE: loop exit
PB: predicated region body
PF: predicated region fallthrough
CT: control target
= control target key end

     0   :  { %18 = vsyncpa [#allocation3], 0  ;;  %s2060_s0 = inlined_call_operand.vmem [shape: f32[8,256], index: 0, kind: input, shape index: {}]   ;;  %s2061_s1 = inlined_call_operand.vmem [shape: f32[9,512], index: 1, kind: input, shape index: {}]   ;;  %s2062_s2 = inlined_call_operand.hbm [shape: f32[512,32], index: 2, kind: input, shape index: {}]   ;;  %s2063_s3 = inlined_call_operand.vmem [shape: f32[8,36], index: 3, kind: input, shape index: {}]   ;;  %s2064_s4 = inlined_call_operand.vmem [shape: f32[8,1], index: 4, kind: input, shape index: {}]   ;;  %s2065_s5 = inlined_call_operand.vmem [shape: f32[128,64], index: 5, kind: input, shape index: {}]   ;;  %s2066_s6 = inlined_call_operand.vmem [shape: f32[1,64], index: 6, kind: input, shape index: {}]   ;;  %s2067_s7 = inlined_call_operand.vmem [shape: f32[1,64], index: 7, kind: input, shape index: {}]   ;;  %s2068_s8 = inlined_call_operand.vmem [shape: f32[1,64], index: 8, kind: input, shape index: {}]   ;;  %s2069_s9 = inlined_call_operand.vmem [shape: f32[64,32], index: 9, kind: input, shape index: {}]   ;;  %s2070_s10 = inlined_call_operand.vmem [shape: f32[1,32], index: 10, kind: input, shape index: {}]   ;;  %s2071_s11 = inlined_call_operand.hbm [shape: f32[2,32], index: 11, kind: output, shape index: {0}]   ;;  %s2072_s12 = inlined_call_operand.hbm [shape: f32[2,128], index: 12, kind: output, shape index: {1}]  }
   0x1   :  { %19 = vsyncpa [#allocation4], 0 }
   0x2   :  { %20 = vsyncpa [#allocation7], 0  ;;  %s1484_s21 = smov [#allocation2]   ;;  %s1412_s25 = scalar_lea.hbm %s2062_s2, 8192 }
   0x3   :  { %s30_s22 = sshll.u32 %s1484_s21, 4  ;;  %p1413_p0 = scmp.ne.s32.totalorder %s2062_s2, %s1412_s25  ;;  %s31_s22 = int_to_ptr.vmem [resolvable:$true] %s30_s22 }
   0x4   :  { %p1416_p1 = scmp.lt.u32.totalorder %s1412_s25, %s2062_s2 }
   0x6   :  { %p1418_p2 = pnand %p1416_p1, %p1413_p0 }
   0x8   :  { %1421 = shalt.err (!%p1418_p2)
}
   0x9   :  { %s1422_s30 = scalar_lea.vmem %s31_s22, 8192  ;;  %p1427_p4 = scmp.lt.s32.totalorder %s31_s22, %s31_s22 }
   0xa   :  { %p1423_p3 = scmp.ne.s32.totalorder %s31_s22, %s1422_s30  ;;  %p1428_p5 = scmp.lt.s32.totalorder %s1422_s30, %s1422_s30 }
   0xc   :  { %p1429_p6 = por %p1428_p5, %p1427_p4 }
   0xe   :  { %p1430_p7 = pnand %p1429_p6, %p1423_p3 }
  0x10   :  { %1433 = shalt.err (!%p1430_p7)
}
  0x11   :  { %s1485_s13 = smov 128   ;;  %s1486_s14 = smov 8  }
  0x12   :  { %36 = dma.hbm_to_vmem [thread:$0]  %s2062_s2, 8192, %s31_s22, [#allocation3], %s1485_s13, %s1485_s13, %s1486_s14  }
  0x13   :  { %1478 = dma.done.wait [#allocation3], 8192  }
  0x14   :  { %1479 = vsyncadd [#allocation3], 4294959104  ;;  %v1586_v0 = vld [vmem:[%s2060_s0] sm:$0xff]  ;;  %s1487_s19 = smov 1   ;;  %s1488_s20 = smov 16   ;;  %v1595_v1 = vld [vmem:[%s2060_s0 + $0x8] sm:$0xff]  ;;  %v80_v46 = vlaneseq }
  0x15   :  { %173 = vrot.lane.b32.xlu1 %v1586_v0, %s1487_s19  ;;  %107 = vrot.lane.b32.xlu0 %v1586_v0, %s1488_s20  ;;  %v1602_v2 = vrot.slane %v1595_v1, 4  ;;  %s1489_s2 = smov 17   ;;  %s1490_s0 = smov 15   ;;  %v1615_v3 = vrot.slane %v1586_v0, 4  ;;  %v1494_v4 = vmov 0.0   ;;  %v404_v5 = vld [vmem:[%s2064_s4] sm:$0xff] }
  0x16   :  { %s1491_s22 = smov 127   ;;  %s1492_s24 = smov 112   ;;  %490 = vmatprep.mubr.f32.mxu1 %v1494_v4  ;;  %v588_v6 = vld [vmem:[#allocation2 + $0x80] sm:$0xff]  ;;  %v589_v7 = vld [vmem:[#allocation2 + $0x88] sm:$0xff]  ;;  %v590_v11 = vld [vmem:[#allocation2 + $0x90] sm:$0xff]  ;;  %v1496_v12 = vmov 0  }
  0x17   :  { %s1493_s25 = smov 113   ;;  %s1495_s26 = smov 111   ;;  %v1287_v8 = vpack.c.bf16 %v589_v7, %v588_v6  ;;  %v572_v9 = vld [vmem:[#allocation2] sm:$0xff]  ;;  %v573_v10 = vld [vmem:[#allocation2 + $0x8] sm:$0xff]  ;;  %1409 = vset.pattern.permute.xlu0 %v1496_v12  ;;  %v591_v14 = vld [vmem:[#allocation2 + $0x98] sm:$0xff]  ;;  %v1647_v49 = vshrl.u32 %v80_v46, 7 }
  0x18   :  { %v1289_v13 = vpack.c.bf16 %v573_v10, %v572_v9  ;;  %v574_v15 = vld [vmem:[#allocation2 + $0x10] sm:$0xff]  ;;  %v575_v16 = vld [vmem:[#allocation2 + $0x18] sm:$0xff]  ;;  %v1291_v17 = vpack.c.bf16 %v591_v14, %v590_v11  ;;  %v592_v18 = vld [vmem:[#allocation2 + $0xa0] sm:$0xff]  ;;  %v1649_v50 = vand.u32 127, %v80_v46  ;;  %vm386_vm4 = vcmask 1043456   ;;  %s1498_s4 = smov 32  }
  0x19   :  { %175 = vrot.lane.b32.xlu1 %v1595_v1, %s1487_s19  ;;  %109 = vrot.lane.b32.xlu0 %v1595_v1, %s1488_s20  ;;  %v593_v19 = vld [vmem:[#allocation2 + $0xa8] sm:$0xff]  ;;  %v1293_v20 = vpack.c.bf16 %v575_v16, %v574_v15  ;;  %v576_v22 = vld [vmem:[#allocation2 + $0x20] sm:$0xff]  ;;  %v594_v24 = vld [vmem:[#allocation2 + $0xb0] sm:$0xff]  ;;  %v1656_v53 = vsub.s32 3, %v1647_v49  ;;  %v1664_v55 = vsub.s32 1, %v1647_v49  ;;  %v1673_v58 = vsub.s32 0, %v1647_v49 }
  0x1a   :  { %1288 = vmatprep.subr.bf16.mxu0 %v1287_v8  ;;  %v1295_v21 = vpack.c.bf16 %v593_v19, %v592_v18  ;;  %v577_v23 = vld [vmem:[#allocation2 + $0x28] sm:$0xff]  ;;  %v595_v25 = vld [vmem:[#allocation2 + $0xb8] sm:$0xff]  ;;  %v578_v28 = vld [vmem:[#allocation2 + $0x30] sm:$0xff]  ;;  %vm181_vm0 = vcmp.lt.s32.totalorder %v1649_v50, 1  ;;  %vm115_vm1 = vcmp.lt.s32.totalorder %v1649_v50, 16  ;;  %vm82_vm2 = vcmp.lt.s32.totalorder %v1649_v50, 17 }
  0x1b   :  { %1290 = vmatpush3.bf16.msra.mxu0 %v1289_v13  ;;  %v1297_v26 = vpack.c.bf16 %v577_v23, %v576_v22  ;;  %v1299_v27 = vpack.c.bf16 %v595_v25, %v594_v24  ;;  %v579_v29 = vld [vmem:[#allocation2 + $0x38] sm:$0xff]  ;;  %v596_v30 = vld [vmem:[#allocation2 + $0xc0] sm:$0xff]  ;;  %v597_v31 = vld [vmem:[#allocation2 + $0xc8] sm:$0xff]  ;;  %v1689_v63 = vsub.s32 2, %v1647_v49  ;;  %vm148_vm3 = vcmp.lt.s32.totalorder %v1649_v50, 15  ;;  %s1499_s14 = smov 48  }
  0x1c   :  { %1292 = vmatprep.subr.bf16.mxu0 %v1291_v17  ;;  %v1301_v32 = vpack.c.bf16 %v579_v29, %v578_v28  ;;  %v1303_v33 = vpack.c.bf16 %v597_v31, %v596_v30  ;;  %v580_v34 = vld [vmem:[#allocation2 + $0x40] sm:$0xff]  ;;  %v581_v35 = vld [vmem:[#allocation2 + $0x48] sm:$0xff]  ;;  %v598_v36 = vld [vmem:[#allocation2 + $0xd0] sm:$0xff]  ;;  %vm214_vm5 = vcmp.lt.s32.totalorder %v1649_v50, 127  ;;  %vm280_vm6 = vcmp.lt.s32.totalorder %v1649_v50, 112  ;;  %s1502_s21 = smov 80  }
  0x1d   :  { %179 = vrot.lane.b32.xlu1 %v1602_v2, %s1487_s19  ;;  %113 = vrot.lane.b32.xlu0 %v1602_v2, %s1488_s20  ;;  %v599_v37 = vld [vmem:[#allocation2 + $0xd8] sm:$0xff]  ;;  %v1305_v38 = vpack.c.bf16 %v581_v35, %v580_v34  ;;  %v582_v40 = vld [vmem:[#allocation2 + $0x50] sm:$0xff]  ;;  %v600_v42 = vld [vmem:[#allocation2 + $0xe0] sm:$0xff]  ;;  %vm247_vm7 = vcmp.lt.s32.totalorder %v1649_v50, 113  ;;  %vm313_vm8 = vcmp.lt.s32.totalorder %v1649_v50, 111  ;;  %vm410_vm9 = vcmask 293888  }
  0x1e   :  { %v1307_v39 = vpack.c.bf16 %v599_v37, %v598_v36  ;;  %v583_v41 = vld [vmem:[#allocation2 + $0x58] sm:$0xff]  ;;  %v601_v43 = vld [vmem:[#allocation2 + $0xe8] sm:$0xff]  ;;  %v1685_v62 = vld [vmem:[%s2061_s1] sm:$0xff]  ;;  %vm1501_vm10 = vmmov 0   ;;  %vm805_vm11 = vcmask 130048   ;;  %vm807_vm12 = vcmask 261120  }
  0x1f   :  { %1294 = vmatpush3.bf16.msra.mxu0 %v1293_v20  ;;  %v1309_v44 = vpack.c.bf16 %v583_v41, %v582_v40  ;;  %v1311_v45 = vpack.c.bf16 %v601_v43, %v600_v42  ;;  %v1661_v54 = vld [vmem:[%s2061_s1 + $0x8] sm:$0xff]  ;;  %v189_v10 = vrot.slane %v1685_v62, %v1656_v53  ;;  %v123_v13 = vrot.slane %v1685_v62, %v1664_v55  ;;  %s1504_s18 = smov [#allocation6]  }
  0x20   :  { %1296 = vmatprep.subr.bf16.mxu0 %v1295_v21  ;;  %v193_v59 = vrot.slane %v1661_v54, %v1656_v53  ;;  %v127_v61 = vrot.slane %v1661_v54, %v1664_v55  ;;  %v94_v7 = vrot.slane %v1661_v54, %v1673_v58  ;;  %v160_v14 = vrot.slane %v1661_v54, %v1689_v63  ;;  %v625_v50 = vld [vmem:[#allocation2 + $0x1a8] sm:$0xff] }
  0x21   :  { %74 = vrot.lane.b32.xlu1 %v1595_v1, %s1489_s2  ;;  %72 = vrot.lane.b32.xlu0 %v1586_v0, %s1489_s2  ;;  %v156_v22 = vrot.slane %v1685_v62, %v1689_v63  ;;  %v90_v23 = vrot.slane %v1685_v62, %v1673_v58  ;;  %v1736_v40 = vsub.s32 5, %v1647_v49  ;;  %vm809_vm13 = vcmask 392192  }
  0x22   :  { %vm811_vm14 = vcmask 523264   ;;  %vm813_vm15 = vcmask 654336  }
  0x23   :  { %1298 = vmatpush3.bf16.msra.mxu0 %v1297_v26  ;;  %v226_v46 = vrot.slane %v1661_v54, %v1736_v40 }
  0x24   :  { %1300 = vmatprep.subr.bf16.mxu0 %v1299_v27 }
  0x25   :  { %142 = vrot.lane.b32.xlu1 %v1595_v1, %s1490_s0  ;;  %140 = vrot.lane.b32.xlu0 %v1586_v0, %s1490_s0 }
  0x27   :  { %1302 = vmatpush3.bf16.msra.mxu0 %v1301_v32 }
  0x28   :  { %1304 = vmatprep.subr.bf16.mxu0 %v1303_v33 }
  0x29   :  { %146 = vrot.lane.b32.xlu1 %v1602_v2, %s1490_s0  ;;  %78 = vrot.lane.b32.xlu0 %v1602_v2, %s1489_s2 }
  0x2b   :  { %1306 = vmatpush3.bf16.msra.mxu0 %v1305_v38 }
  0x2c   :  { %1308 = vmatprep.subr.bf16.mxu0 %v1307_v39 }
  0x2d   :  { %208 = vrot.lane.b32.xlu0 %v1595_v1, %s1491_s22  ;;  %210 = vrot.lane.b32.xlu1 %v1615_v3, %s1491_s22 }
  0x2f   :  { %1310 = vmatpush3.bf16.msra.mxu0 %v1309_v44 }
  0x30   :  { %1312 = vmatprep.subr.bf16.mxu0 %v1311_v45  ;;  %v1744_v45 = vsub.s32 7, %v1647_v49 }
  0x31   :  { %274 = vrot.lane.b32.xlu0 %v1595_v1, %s1492_s24  ;;  %276 = vrot.lane.b32.xlu1 %v1615_v3, %s1492_s24 }
  0x35   :  { %206 = vrot.lane.b32.xlu0 %v1586_v0, %s1491_s22  ;;  %272 = vrot.lane.b32.xlu1 %v1586_v0, %s1492_s24 }
  0x39   :  { %241 = vrot.lane.b32.xlu0 %v1595_v1, %s1493_s25  ;;  %243 = vrot.lane.b32.xlu1 %v1615_v3, %s1493_s25 }
  0x3d   :  { %239 = vrot.lane.b32.xlu0 %v1586_v0, %s1493_s25  ;;  %111 = vrot.lane.b32.xlu1 %v1615_v3, %s1488_s20 }
  0x41   :  { %177 = vrot.lane.b32.xlu0 %v1615_v3, %s1487_s19  ;;  %76 = vrot.lane.b32.xlu1 %v1615_v3, %s1489_s2  ;;  %s1500_s19 = smov 64  }
  0x45   :  { %144 = vrot.lane.b32.xlu0 %v1615_v3, %s1490_s0  ;;  %307 = vrot.lane.b32.xlu1 %v1595_v1, %s1495_s26 }
  0x49   :  { %309 = vrot.lane.b32.xlu0 %v1615_v3, %s1495_s26  ;;  %212 = vrot.lane.b32.xlu1 %v1602_v2, %s1491_s22 }
  0x4d   :  { %278 = vrot.lane.b32.xlu0 %v1602_v2, %s1492_s24  ;;  %305 = vrot.lane.b32.xlu1 %v1586_v0, %s1495_s26 }
  0x51   :  { %245 = vrot.lane.b32.xlu0 %v1602_v2, %s1493_s25  ;;  %311 = vrot.lane.b32.xlu1 %v1602_v2, %s1495_s26 }
  0x55   :  { %407 = vperm.xlu0 %1409, %v404_v5  }
  0x87   :  { %v174_v47 = vpop.permute.xlu1 %173  ;;  %v108_v48 = vpop.permute.xlu0 %107 }
  0x8b   :  { %v1651_v51 = vpop.permute.xlu1 %175  ;;  %v1653_v52 = vpop.permute.xlu0 %109 }
  0x8c   :  { %v184_v60 = vsel %vm181_vm0, %v174_v47, %v1651_v51  ;;  %v118_v5 = vsel %vm115_vm1, %v108_v48, %v1653_v52 }
  0x8d   :  { %v203_v9 = vmul.f32 %v193_v59, %v184_v60  ;;  %v137_v12 = vmul.f32 %v127_v61, %v118_v5  ;;  %v292_v60 = vrot.slane %v1661_v54, %v1744_v45  ;;  %v1757_v61 = vsub.s32 6, %v1647_v49 }
  0x8f   :  { %v1668_v56 = vpop.permute.xlu1 %179  ;;  %v1670_v57 = vpop.permute.xlu0 %113  ;;  %v355_v20 = vrot.slane %v203_v9, 4  ;;  %v343_v24 = vrot.slane %v137_v12, 4  ;;  %v288_v12 = vrot.slane %v1685_v62, %v1744_v45  ;;  %v259_v49 = vrot.slane %v1661_v54, %v1757_v61 }
  0x90   :  { %v185_v15 = vsel %vm181_vm0, %v1668_v56, %v174_v47  ;;  %v119_v16 = vsel %vm115_vm1, %v1670_v57, %v108_v48 }
  0x91   :  { %v202_v25 = vmul.f32 %v189_v10, %v185_v15  ;;  %v136_v26 = vmul.f32 %v123_v13, %v119_v16  ;;  %v222_v10 = vrot.slane %v1685_v62, %v1736_v40 }
  0x93   :  { %v1694_v6 = vpop.permute.xlu1 %74  ;;  %v73_v8 = vpop.permute.xlu0 %72  ;;  %v354_v35 = vrot.slane %v202_v25, 4  ;;  %v342_v36 = vrot.slane %v136_v26, 4 }
  0x94   :  { %v85_v11 = vsel %vm82_vm2, %v73_v8, %v1694_v6 }
  0x95   :  { %v104_v17 = vmul.f32 %v94_v7, %v85_v11 }
  0x97   :  { %v1714_v18 = vpop.permute.xlu1 %142  ;;  %v141_v19 = vpop.permute.xlu0 %140  ;;  %v388_v30 = vsel %vm386_vm4, %v104_v17, %v343_v24 }
  0x98   :  { %v151_v21 = vsel %vm148_vm3, %v141_v19, %v1714_v18 }
  0x99   :  { %v170_v27 = vmul.f32 %v160_v14, %v151_v21 }
  0x9b   :  { %v1723_v28 = vpop.permute.xlu1 %146  ;;  %v1725_v29 = vpop.permute.xlu0 %78  ;;  %v392_v31 = vsel %vm386_vm4, %v170_v27, %v355_v20  ;;  %v255_v20 = vrot.slane %v1685_v62, %v1757_v61 }
  0x9c   :  { %v152_v32 = vsel %vm148_vm3, %v1723_v28, %v141_v19  ;;  %v86_v33 = vsel %vm82_vm2, %v1725_v29, %v73_v8  ;;  %v1271_v34 = vpack.c.bf16 %v392_v31, %v388_v30 }
  0x9d   :  { %v169_v37 = vmul.f32 %v156_v22, %v152_v32  ;;  %v103_v38 = vmul.f32 %v90_v23, %v86_v33 }
  0x9e   :  { %1272 = vmatprep.subr.bf16.mxu1 %v1271_v34  ;;  %v1797_v34 = vld [vmem:[%s2061_s1 + $0x10] sm:$0xff] }
  0x9f   :  { %v209_v39 = vpop.permute.xlu0 %208  ;;  %v1738_v41 = vpop.permute.xlu1 %210  ;;  %v387_v42 = vsel %vm386_vm4, %v103_v38, %v342_v36  ;;  %v391_v43 = vsel %vm386_vm4, %v169_v37, %v354_v35  ;;  %v1802_v35 = vld [vmem:[%s2061_s1 + $0x18] sm:$0xff]  ;;  %v131_v38 = vrot.slane %v1797_v34, %v1664_v55 }
  0xa0   :  { %v1273_v44 = vpack.c.bf16 %v391_v43, %v387_v42  ;;  %v216_v59 = vsel %vm214_vm5, %v209_v39, %v1738_v41  ;;  %v197_v42 = vrot.slane %v1797_v34, %v1656_v53 }
  0xa1   :  { %v236_v7 = vmul.f32 %v226_v46, %v216_v59  ;;  %v98_v46 = vrot.slane %v1797_v34, %v1673_v58 }
  0xa2   :  { %1274 = vmatpush1.bf16.msra.mxu1 %v1273_v44  ;;  %v201_v44 = vrot.slane %v1802_v35, %v1656_v53  ;;  %v168_v53 = vrot.slane %v1802_v35, %v1689_v63 }
  0xa3   :  { %v275_v47 = vpop.permute.xlu0 %274  ;;  %v1749_v48 = vpop.permute.xlu1 %276  ;;  %v367_v15 = vrot.slane %v236_v7, 4 }
  0xa4   :  { %v282_v5 = vsel %vm280_vm6, %v275_v47, %v1749_v48 }
  0xa5   :  { %v302_v11 = vmul.f32 %v292_v60, %v282_v5  ;;  %v396_v26 = vsel %vm386_vm4, %v1595_v1, %v367_v15 }
  0xa7   :  { %v1762_v8 = vpop.permute.xlu0 %206  ;;  %v1764_v9 = vpop.permute.xlu1 %272  ;;  %v379_v54 = vrot.slane %v302_v11, 4  ;;  %v300_v11 = vrot.slane %v1802_v35, %v1744_v45 }
  0xa8   :  { %v217_v13 = vsel %vm214_vm5, %v1762_v8, %v209_v39  ;;  %v283_v14 = vsel %vm280_vm6, %v1764_v9, %v275_v47  ;;  %v135_v39 = vrot.slane %v1802_v35, %v1664_v55  ;;  %v102_v47 = vrot.slane %v1802_v35, %v1673_v58 }
  0xa9   :  { %v235_v21 = vmul.f32 %v222_v10, %v217_v13  ;;  %v301_v22 = vmul.f32 %v288_v12, %v283_v14  ;;  %v234_v10 = vrot.slane %v1802_v35, %v1736_v40  ;;  %v1107_v13 = vld [vmem:[%s2061_s1 + $0x28] ss:$0 sm:$0xff] }
  0xab   :  { %v242_v16 = vpop.permute.xlu0 %241  ;;  %v1779_v17 = vpop.permute.xlu1 %243  ;;  %v366_v32 = vrot.slane %v235_v21, 4  ;;  %v378_v33 = vrot.slane %v301_v22, 4 }
  0xac   :  { %v249_v19 = vsel %vm247_vm7, %v242_v16, %v1779_v17 }
  0xad   :  { %v269_v23 = vmul.f32 %v259_v49, %v249_v19  ;;  %v395_v43 = vsel %vm386_vm4, %v1586_v0, %v366_v32  ;;  %v164_v0 = vrot.slane %v1797_v34, %v1689_v63 }
  0xaf   :  { %v1786_v24 = vpop.permute.xlu0 %239  ;;  %v112_v25 = vpop.permute.xlu1 %111  ;;  %v400_v27 = vsel %vm386_vm4, %v269_v23, %v379_v54  ;;  %v267_v23 = vrot.slane %v1802_v35, %v1757_v61 }
  0xb0   :  { %v250_v30 = vsel %vm247_vm7, %v1786_v24, %v242_v16  ;;  %v1275_v31 = vpack.c.bf16 %v400_v27, %v396_v26  ;;  %v117_v55 = vsel %vm115_vm1, %v1653_v52, %v112_v25  ;;  %v116_v58 = vsel %vm115_vm1, %v112_v25, %v1670_v57 }
  0xb1   :  { %v268_v62 = vmul.f32 %v255_v20, %v250_v30  ;;  %v296_v57 = vrot.slane %v1797_v34, %v1744_v45  ;;  %v1106_v30 = vld [vmem:[%s2061_s1 + $0x20] ss:$0 sm:$0xff]  ;;  %vm817_vm1 = vcmask 916480  }
  0xb2   :  { %1276 = vmatprep.subr.bf16.mxu1 %v1275_v31 }
  0xb3   :  { %v178_v1 = vpop.permute.xlu0 %177  ;;  %v77_v36 = vpop.permute.xlu1 %76  ;;  %v399_v37 = vsel %vm386_vm4, %v268_v62, %v378_v33 }
  0xb4   :  { %v1277_v59 = vpack.c.bf16 %v399_v37, %v395_v43  ;;  %v182_v60 = vsel %vm181_vm0, %v178_v1, %v1668_v56  ;;  %v183_v52 = vsel %vm181_vm0, %v1651_v51, %v178_v1  ;;  %v230_v56 = vrot.slane %v1797_v34, %v1736_v40 }
  0xb5   :  { %v138_v51 = vmul.f32 %v131_v38, %v117_v55  ;;  %v205_v12 = vmul.f32 %v201_v44, %v182_v60  ;;  %v139_v40 = vmul.f32 %v135_v39, %v116_v58  ;;  %v204_v14 = vmul.f32 %v197_v42, %v183_v52  ;;  %v403_v42 = vld [vmem:[%s2063_s3] sm:$0xff] }
  0xb6   :  { %1278 = vmatpush1.bf16.msra.mxu1 %v1277_v59  ;;  %v83_v15 = vsel %vm82_vm2, %v77_v36, %v1725_v29  ;;  %v84_v45 = vsel %vm82_vm2, %v1694_v6, %v77_v36  ;;  %vm815_vm0 = vcmask 785408   ;;  %vm851_vm2 = vcmask 1040384  }
  0xb7   :  { %v145_v5 = vpop.permute.xlu0 %144  ;;  %v308_v7 = vpop.permute.xlu1 %307  ;;  %v344_v6 = vrot.slane %v138_v51, 4  ;;  %v357_v25 = vrot.slane %v205_v12, 4  ;;  %v106_v26 = vmul.f32 %v102_v47, %v83_v15  ;;  %v345_v31 = vrot.slane %v139_v40, 4  ;;  %v621_v51 = vld [vmem:[#allocation2 + $0x188] sm:$0xff]  ;;  %v1108_v12 = vld [vmem:[%s2061_s1 + $0x30] ss:$0 sm:$0xff] }
  0xb8   :  { %v149_v63 = vsel %vm148_vm3, %v145_v5, %v1723_v28  ;;  %v150_v49 = vsel %vm148_vm3, %v1714_v18, %v145_v5  ;;  %v263_v28 = vrot.slane %v1797_v34, %v1757_v61  ;;  %v105_v32 = vmul.f32 %v98_v46, %v84_v45  ;;  %v605_v40 = vld [vmem:[#allocation2 + $0x108] sm:$0xff] }
  0xb9   :  { %v172_v18 = vmul.f32 %v168_v53, %v149_v63  ;;  %v171_v22 = vmul.f32 %v164_v0, %v150_v49  ;;  %vm947_vm3 = vcmask 517120  }
  0xba   :  { %v389_v44 = vsel %vm386_vm4, %v105_v32, %v344_v6  ;;  %v626_v6 = vld [vmem:[#allocation2 + $0x1b0] sm:$0xff] }
  0xbb   :  { %v310_v16 = vpop.permute.xlu0 %309  ;;  %v213_v19 = vpop.permute.xlu1 %212  ;;  %v394_v1 = vsel %vm386_vm4, %v172_v18, %v357_v25  ;;  %v627_v25 = vld [vmem:[#allocation2 + $0x1b8] sm:$0xff] }
  0xbc   :  { %v315_v20 = vsel %vm313_vm8, %v308_v7, %v310_v16  ;;  %v215_v54 = vsel %vm214_vm5, %v1738_v41, %v213_v19  ;;  %v218_v21 = vsel %vm214_vm5, %v213_v19, %v1762_v8  ;;  %v356_v41 = vrot.slane %v204_v14, 4  ;;  %v622_v14 = vld [vmem:[#allocation2 + $0x190] sm:$0xff] }
  0xbd   :  { %v335_v29 = vmul.f32 %v1107_v13, %v315_v20  ;;  %v237_v27 = vmul.f32 %v230_v56, %v215_v54  ;;  %v238_v33 = vmul.f32 %v234_v10, %v218_v21  ;;  %v606_v20 = vld [vmem:[#allocation2 + $0x110] sm:$0xff]  ;;  %v607_v54 = vld [vmem:[#allocation2 + $0x118] sm:$0xff]  ;;  %v624_v21 = vld [vmem:[#allocation2 + $0x1a0] sm:$0xff] }
  0xbe   :  { %v393_v36 = vsel %vm386_vm4, %v171_v22, %v356_v41  ;;  %v1327_v22 = vpack.c.bf16 %v625_v50, %v624_v21  ;;  %v610_v41 = vld [vmem:[#allocation2 + $0x130] sm:$0xff] }
  0xbf   :  { %v279_v62 = vpop.permute.xlu0 %278  ;;  %1110 = vmatprep.subr.msk.mxu1 %vm386_vm4, %v335_v29  ;;  %v306_v8 = vpop.permute.xlu1 %305  ;;  %v368_v43 = vrot.slane %v237_v27, 4  ;;  %v1281_v0 = vpack.c.bf16 %v393_v36, %v389_v44  ;;  %v608_v29 = vld [vmem:[#allocation2 + $0x120] sm:$0xff]  ;;  %v1331_v27 = vpack.c.bf16 %v627_v25, %v626_v6  ;;  %v586_v36 = vld [vmem:[#allocation2 + $0x70] sm:$0xff]  ;;  %v859_v25 = vld [vmem:[%s2065_s5 + $0x28] sm:$0xff] }
  0xc0   :  { %v281_v61 = vsel %vm280_vm6, %v1749_v48, %v279_v62  ;;  %v284_v34 = vsel %vm280_vm6, %v279_v62, %v1764_v9  ;;  %v316_v35 = vsel %vm313_vm8, %v306_v8, %v308_v7  ;;  %v390_v48 = vsel %vm386_vm4, %v106_v26, %v345_v31  ;;  %v585_v31 = vld [vmem:[#allocation2 + $0x68] sm:$0xff]  ;;  %v630_v44 = vld [vmem:[#allocation2 + $0x1d0] sm:$0xff]  ;;  %v858_v6 = vld [vmem:[%s2065_s5 + $0x20] sm:$0xff] }
  0xc1   :  { %v303_v37 = vmul.f32 %v296_v57, %v281_v61  ;;  %v304_v38 = vmul.f32 %v300_v11, %v284_v34  ;;  %v334_v39 = vmul.f32 %v1106_v30, %v316_v35  ;;  %v369_v9 = vrot.slane %v238_v33, 4  ;;  %v584_v30 = vld [vmem:[#allocation2 + $0x60] sm:$0xff]  ;;  %v611_v33 = vld [vmem:[#allocation2 + $0x138] sm:$0xff] }
  0xc2   :  { %v1279_v47 = vpack.c.bf16 %v394_v1, %v390_v48  ;;  %v397_v52 = vsel %vm386_vm4, %v1615_v3, %v368_v43  ;;  %v620_v3 = vld [vmem:[#allocation2 + $0x180] sm:$0xff]  ;;  %v1313_v32 = vpack.c.bf16 %v585_v31, %v584_v30  ;;  %v1333_v62 = vpack.c.bf16 %v611_v33, %v610_v41  ;;  %v603_v61 = vld [vmem:[#allocation2 + $0xf8] sm:$0xff]  ;;  %v629_v1 = vld [vmem:[#allocation2 + $0x1c8] sm:$0xff] }
  0xc3   :  { %v246_v46 = vpop.permute.xlu0 %245  ;;  %1111 = vmatpush1.msk.msra.mxu1 %vm386_vm4, %v334_v39  ;;  %v312_v60 = vpop.permute.xlu1 %311  ;;  %v380_v53 = vrot.slane %v303_v37, 4  ;;  %v381_v5 = vrot.slane %v304_v38, 4  ;;  %v398_v63 = vsel %vm386_vm4, %v1602_v2, %v369_v9  ;;  %v623_v2 = vld [vmem:[#allocation2 + $0x198] sm:$0xff]  ;;  %v1319_v15 = vpack.c.bf16 %v621_v51, %v620_v3  ;;  %v628_v34 = vld [vmem:[#allocation2 + $0x1c0] sm:$0xff]  ;;  %v613_v43 = vld [vmem:[#allocation2 + $0x148] sm:$0xff] }
  0xc4   :  { %v248_v59 = vsel %vm247_vm7, %v1779_v17, %v246_v46  ;;  %v251_v55 = vsel %vm247_vm7, %v246_v46, %v1786_v24  ;;  %1112 = vmatmul.mubr.msk.f32.vlgmr.msra.gmra.mrb[0].mxu1 %vm410_vm9, %v403_v42  ;;  %1280 = vmatprep.subr.bf16.mxu1 %v1279_v47  ;;  %v1109_v24 = vld [vmem:[%s2061_s1 + $0x38] ss:$0 sm:$0xff]  ;;  %v317_v56 = vsel %vm313_vm8, %v312_v60, %v306_v8  ;;  %v602_v8 = vld [vmem:[#allocation2 + $0xf0] sm:$0xff] }
  0xc5   :  { %v270_v7 = vmul.f32 %v263_v28, %v248_v59  ;;  %v271_v58 = vmul.f32 %v267_v23, %v251_v55  ;;  %1282 = vmatpush1.bf16.msra.mxu1 %v1281_v0  ;;  %561 = vmatprep.mubr.f32.mxu1 %v1494_v4  ;;  %v314_v49 = vsel %vm313_vm8, %v310_v16, %v312_v60  ;;  %v604_v28 = vld [vmem:[#allocation2 + $0x100] sm:$0xff]  ;;  %v609_v23 = vld [vmem:[#allocation2 + $0x128] sm:$0xff]  ;;  %v587_v37 = vld [vmem:[#allocation2 + $0x78] sm:$0xff] }
  0xc6   :  { %v337_v13 = vmul.f32 %v1109_v24, %v317_v56  ;;  %v336_v45 = vmul.f32 %v1108_v12, %v314_v49  ;;  %v1321_v19 = vpack.c.bf16 %v605_v40, %v604_v28  ;;  %v1323_v18 = vpack.c.bf16 %v623_v2, %v622_v14  ;;  %1314 = vmatpush3.bf16.msra.mxu0 %v1313_v32  ;;  %v631_v9 = vld [vmem:[#allocation2 + $0x1d8] sm:$0xff]  ;;  %v614_v47 = vld [vmem:[#allocation2 + $0x150] sm:$0xff]  ;;  %v632_v55 = vld [vmem:[#allocation2 + $0x1e0] sm:$0xff] }
  0xc7   :  { %v401_v17 = vsel %vm386_vm4, %v270_v7, %v380_v53  ;;  %v402_v10 = vsel %vm386_vm4, %v271_v58, %v381_v5  ;;  %v1325_v16 = vpack.c.bf16 %v607_v54, %v606_v20  ;;  %v1329_v26 = vpack.c.bf16 %v609_v23, %v608_v29  ;;  %v615_v59 = vld [vmem:[#allocation2 + $0x158] sm:$0xff]  ;;  %v633_v0 = vld [vmem:[#allocation2 + $0x1e8] sm:$0xff]  ;;  %v616_v5 = vld [vmem:[#allocation2 + $0x160] sm:$0xff] }
  0xc8   :  { %v1283_v57 = vpack.c.bf16 %v402_v10, %v398_v63  ;;  %v1285_v11 = vpack.c.bf16 %v401_v17, %v397_v52  ;;  %v1315_v35 = vpack.c.bf16 %v603_v61, %v602_v8  ;;  %v1335_v38 = vpack.c.bf16 %v629_v1, %v628_v34  ;;  %v617_v7 = vld [vmem:[#allocation2 + $0x168] sm:$0xff]  ;;  %v634_v52 = vld [vmem:[#allocation2 + $0x1f0] sm:$0xff]  ;;  %v635_v17 = vld [vmem:[#allocation2 + $0x1f8] sm:$0xff] }
  0xc9   :  { %v1317_v39 = vpack.c.bf16 %v587_v37, %v586_v36  ;;  %v1339_v46 = vpack.c.bf16 %v631_v9, %v630_v44  ;;  %v1341_v60 = vpack.c.bf16 %v615_v59, %v614_v47  ;;  %v1343_v53 = vpack.c.bf16 %v633_v0, %v632_v55  ;;  %v618_v56 = vld [vmem:[#allocation2 + $0x170] sm:$0xff]  ;;  %v619_v63 = vld [vmem:[#allocation2 + $0x178] sm:$0xff]  ;;  %v862_v61 = vld [vmem:[%s2065_s5 + $0x40] sm:$0xff] }
  0xca   :  { %1284 = vmatprep.subr.bf16.mxu1 %v1283_v57  ;;  %1316 = vmatprep.subr.bf16.mxu0 %v1315_v35  ;;  %v1345_v58 = vpack.c.bf16 %v617_v7, %v616_v5  ;;  %v1347_v24 = vpack.c.bf16 %v635_v17, %v634_v52  ;;  %v1349_v10 = vpack.c.bf16 %v619_v63, %v618_v56  ;;  %v1497_v20 = vmov 0.0|0.0   ;;  %v857_v29 = vld [vmem:[%s2065_s5 + $0x18] sm:$0xff]  ;;  %v860_v41 = vld [vmem:[%s2065_s5 + $0x30] sm:$0xff]  ;;  %v863_v34 = vld [vmem:[%s2065_s5 + $0x48] sm:$0xff] }
  0xcb   :  { %1286 = vmatpush1.bf16.msra.mxu1 %v1285_v11  ;;  %1318 = vmatpush3.bf16.msra.mxu0 %v1317_v39  ;;  %v861_v32 = vld [vmem:[%s2065_s5 + $0x38] sm:$0xff]  ;;  %v1364_v1 = vpack.c.bf16 %v863_v34, %v862_v61  ;;  %v864_v36 = vld [vmem:[%s2065_s5 + $0x50] sm:$0xff] }
  0xcc   :  { %1113 = vmatprep.subr.msk.mxu1 %vm386_vm4, %v337_v13  ;;  %1351 = vmatprep.subr.bf16.mxu0 %v1497_v20  ;;  %v865_v37 = vld [vmem:[%s2065_s5 + $0x58] sm:$0xff]  ;;  %v868_v9 = vld [vmem:[%s2065_s5 + $0x70] sm:$0xff] }
  0xcd   :  { %v1367_v39 = vpack.c.bf16 %v865_v37, %v864_v36 }
  0xcf   :  { %1114 = vmatpush1.msk.msra.mxu1 %vm386_vm4, %v336_v45 }
  0xd0   :  { %1115 = vmatmul.mubr.msk.f32.vlgmr.msra.gmra.mrb[2].mxu1 %vm410_vm9, %v403_v42  ;;  %1320 = vmatprep.subr.bf16.mxu1 %v1319_v15  ;;  %v612_v42 = vld [vmem:[#allocation2 + $0x140] sm:$0xff] }
  0xd1   :  { %1322 = vmatpush3.bf16.msra.mxu1 %v1321_v19  ;;  %v1337_v48 = vpack.c.bf16 %v613_v43, %v612_v42  ;;  %v854_v19 = vld [vmem:[%s2065_s5] sm:$0xff]  ;;  %v867_v43 = vld [vmem:[%s2065_s5 + $0x68] sm:$0xff] }
  0xd2   :  { %1324 = vmatprep.subr.bf16.mxu1 %v1323_v18  ;;  %v855_v18 = vld [vmem:[%s2065_s5 + $0x8] sm:$0xff]  ;;  %v866_v42 = vld [vmem:[%s2065_s5 + $0x60] sm:$0xff] }
  0xd3   :  { %v1352_v54 = vpack.c.bf16 %v855_v18, %v854_v19  ;;  %v1370_v44 = vpack.c.bf16 %v867_v43, %v866_v42 }
  0xd4   :  { %v408_v57 = vpop.permute.xlu0 %407 }
  0xd5   :  { %1326 = vmatpush3.bf16.msra.mxu1 %v1325_v16 }
  0xd6   :  { %1328 = vmatprep.subr.bf16.mxu1 %v1327_v22  ;;  %v856_v22 = vld [vmem:[%s2065_s5 + $0x10] sm:$0xff] }
  0xd7   :  { %v1355_v23 = vpack.c.bf16 %v857_v29, %v856_v22  ;;  %v988_v22 = vld [vmem:[%s2069_s9 + $0x8] sm:$0xff] }
  0xd9   :  { %1330 = vmatpush3.bf16.msra.mxu1 %v1329_v26 }
  0xda   :  { %1332 = vmatprep.subr.bf16.mxu1 %v1331_v27  ;;  %v1358_v27 = vpack.c.bf16 %v859_v25, %v858_v6  ;;  %v990_v6 = vld [vmem:[%s2069_s9 + $0x18] sm:$0xff] }
  0xdd   :  { %1334 = vmatpush3.bf16.msra.mxu1 %v1333_v62  ;;  %v1361_v62 = vpack.c.bf16 %v861_v32, %v860_v41  ;;  %v994_v41 = vld [vmem:[%s2069_s9 + $0x38] sm:$0xff] }
  0xde   :  { %1336 = vmatprep.subr.bf16.mxu1 %v1335_v38 }
  0xe1   :  { %1338 = vmatpush3.bf16.msra.mxu1 %v1337_v48 }
  0xe2   :  { %1340 = vmatprep.subr.bf16.mxu1 %v1339_v46  ;;  %v869_v46 = vld [vmem:[%s2065_s5 + $0x78] sm:$0xff]  ;;  %s1503_s5 = smov 96  }
  0xe3   :  { %v1373_v47 = vpack.c.bf16 %v869_v46, %v868_v9 }
  0xe5   :  { %1342 = vmatpush3.bf16.msra.mxu1 %v1341_v60 }
  0xe6   :  { %1344 = vmatprep.subr.bf16.mxu1 %v1343_v53 }
  0xe9   :  { %1346 = vmatpush3.bf16.msra.mxu1 %v1345_v58 }
  0xea   :  { %1348 = vmatprep.subr.bf16.mxu1 %v1347_v24 }
  0xed   :  { %1350 = vmatpush3.bf16.msra.mxu1 %v1349_v10 }
  0xee   :  { %1375 = vmatprep.subr.bf16.mxu1 %v1497_v20 }
 0x197   :  { %v492_v11 = vpop.f32.mrb[0].mxu1 }
 0x198   :  { %v494_v3 = vpop.f32.mrb[1].mxu1  ;;  %v493_v51 = vadd.f32 %v492_v11, %v408_v57 }
 0x199   :  { %v495_v12 = vadd.f32 %v494_v3, %v408_v57 }
 0x19a   :  { %v568_v49 = vmax.f32 %v493_v51, 0.0 }
 0x19b   :  { %v569_v13 = vmax.f32 %v495_v12, 0.0 }
 0x19d   :  { %700 = vmatprep.mubr.f32.mxu0 %v569_v13 }
 0x19e   :  { %701 = vmatmul.mubr.f32.vlgmr.msra.gmra.mrb[0].mxu0 %v568_v49 }
 0x19f   :  { %1353 = vmatpush3.bf16.msra.mxu0 %v1352_v54  ;;  %1249 = vmatprep.mubr.msk.f32.mxu0 %vm1501_vm10, %v1494_v4 }
 0x1a0   :  { %1354 = vmatprep.subr.bf16.mxu0 %v1497_v20 }
 0x1a3   :  { %v563_v28 = vpop.f32.mrb[2].mxu1  ;;  %1356 = vmatpush3.bf16.msra.mxu0 %v1355_v23  ;;  %v989_v23 = vld [vmem:[%s2069_s9 + $0x10] sm:$0xff] }
 0x1a4   :  { %v564_v40 = vadd.f32 %v563_v28, %v408_v57  ;;  %v565_v14 = vpop.f32.mrb[3].mxu1  ;;  %1357 = vmatprep.subr.bf16.mxu0 %v1497_v20  ;;  %v1379_v25 = vpack.c.bf16 %v990_v6, %v989_v23 }
 0x1a5   :  { %v566_v2 = vadd.f32 %v565_v14, %v408_v57 }
 0x1a6   :  { %v570_v45 = vmax.f32 %v564_v40, 0.0 }
 0x1a7   :  { %v571_v15 = vmax.f32 %v566_v2, 0.0  ;;  %1359 = vmatpush3.bf16.msra.mxu0 %v1358_v27  ;;  %v992_v27 = vld [vmem:[%s2069_s9 + $0x28] sm:$0xff] }
 0x1a8   :  { %1360 = vmatprep.subr.bf16.mxu0 %v1497_v20 }
 0x1a9   :  { %770 = vmatprep.mubr.f32.mxu1 %v571_v15 }
 0x1aa   :  { %771 = vmatmul.mubr.f32.vlgmr.msra.gmra.mrb[4].mxu1 %v570_v45 }
 0x1ab   :  { %1362 = vmatpush3.bf16.msra.mxu0 %v1361_v62  ;;  %1268 = vmatprep.mubr.msk.f32.mxu1 %vm1501_vm10, %v1494_v4 }
 0x1ac   :  { %1363 = vmatprep.subr.bf16.mxu0 %v1497_v20 }
 0x1af   :  { %1365 = vmatpush3.bf16.msra.mxu0 %v1364_v1 }
 0x1b0   :  { %1366 = vmatprep.subr.bf16.mxu0 %v1497_v20 }
 0x1b3   :  { %1368 = vmatpush3.bf16.msra.mxu0 %v1367_v39 }
 0x1b4   :  { %1369 = vmatprep.subr.bf16.mxu0 %v1497_v20 }
 0x1b7   :  { %1371 = vmatpush3.bf16.msra.mxu0 %v1370_v44 }
 0x1b8   :  { %1372 = vmatprep.subr.bf16.mxu0 %v1497_v20 }
 0x1bb   :  { %1374 = vmatpush3.bf16.msra.mxu0 %v1373_v47 }
 0x271   :  { %v1153_v21 = vpop.f32.mrb[0].mxu0 }
 0x272   :  { %v1154_v50 = vpop.f32.mrb[1].mxu0 }
 0x273   :  { %v1155_v16 = vadd.f32 %v1154_v50, %v1153_v21 }
 0x27d   :  { %v1188_v26 = vpop.f32.mrb[4].mxu1 }
 0x27e   :  { %v1189_v30 = vpop.f32.mrb[5].mxu1 }
 0x27f   :  { %v1190_v31 = vadd.f32 %v1189_v30, %v1188_v26  ;;  %v991_v26 = vld [vmem:[%s2069_s9 + $0x20] sm:$0xff] }
 0x280   :  { %v1382_v30 = vpack.c.bf16 %v992_v27, %v991_v26 }
 0x281   :  { %v1947_v33 = vadd.f32 %v1190_v31, %v1155_v16  ;;  %v987_v16 = vld [vmem:[%s2069_s9] sm:$0xff]  ;;  %v993_v31 = vld [vmem:[%s2069_s9 + $0x30] sm:$0xff] }
 0x282   :  { %v1376_v29 = vpack.c.bf16 %v988_v22, %v987_v16  ;;  %v1385_v32 = vpack.c.bf16 %v994_v41, %v993_v31 }
 0x283   :  { %819 = vrot.lane.b32.xlu1 %v1947_v33, %s1492_s24  ;;  %v777_v8 = vrot.slane %v1947_v33, 1  ;;  %v781_v35 = vrot.slane %v1947_v33, 2  ;;  %v785_v38 = vrot.slane %v1947_v33, 3  ;;  %v789_v48 = vrot.slane %v1947_v33, 4 }
 0x284   :  { %v793_v59 = vrot.slane %v1947_v33, 5  ;;  %v797_v55 = vrot.slane %v1947_v33, 6  ;;  %v801_v60 = vrot.slane %v1947_v33, 7  ;;  %1377 = vmatpush3.bf16.msra.mxu1 %v1376_v29 }
 0x285   :  { %778 = vrot.lane.b32.xlu0 %v777_v8, %s1488_s20  ;;  %1378 = vmatprep.subr.bf16.mxu1 %v1497_v20 }
 0x287   :  { %823 = vrot.lane.b32.xlu1 %v781_v35, %s1488_s20 }
 0x288   :  { %1380 = vmatpush3.bf16.msra.mxu1 %v1379_v25 }
 0x289   :  { %782 = vrot.lane.b32.xlu0 %v781_v35, %s1498_s4  ;;  %1381 = vmatprep.subr.bf16.mxu1 %v1497_v20 }
 0x28b   :  { %826 = vrot.lane.b32.xlu1 %v785_v38, %s1498_s4 }
 0x28c   :  { %1383 = vmatpush3.bf16.msra.mxu1 %v1382_v30 }
 0x28d   :  { %786 = vrot.lane.b32.xlu0 %v785_v38, %s1499_s14  ;;  %1384 = vmatprep.subr.bf16.mxu1 %v1497_v20 }
 0x28f   :  { %829 = vrot.lane.b32.xlu1 %v789_v48, %s1499_s14 }
 0x290   :  { %1386 = vmatpush3.bf16.msra.mxu1 %v1385_v32 }
 0x291   :  { %790 = vrot.lane.b32.xlu0 %v789_v48, %s1500_s19 }
 0x293   :  { %832 = vrot.lane.b32.xlu1 %v793_v59, %s1500_s19  ;;  %s1093_s19 = sshll.u32 %s1504_s18, 4  ;;  %s1094_s19 = int_to_ptr.vmem [resolvable:$true] %s1093_s19 }
 0x294   :  { %p1439_p9 = scmp.lt.s32.totalorder %s1094_s19, %s1094_s19 }
 0x295   :  { %794 = vrot.lane.b32.xlu0 %v793_v59, %s1502_s21 }
 0x297   :  { %835 = vrot.lane.b32.xlu1 %v797_v55, %s1502_s21  ;;  %s1434_s21 = scalar_lea.vmem %s1094_s19, 32 }
 0x298   :  { %p1435_p8 = scmp.ne.s32.totalorder %s1094_s19, %s1434_s21  ;;  %p1440_p10 = scmp.lt.s32.totalorder %s1434_s21, %s1434_s21 }
 0x299   :  { %798 = vrot.lane.b32.xlu0 %v797_v55, %s1503_s5 }
 0x29a   :  { %p1441_p11 = por %p1440_p10, %p1439_p9 }
 0x29b   :  { %838 = vrot.lane.b32.xlu1 %v801_v60, %s1503_s5 }
 0x29c   :  { %p1442_p12 = pnand %p1441_p11, %p1435_p8 }
 0x29f   :  { %802 = vrot.lane.b32.xlu1 %v801_v60, %s1492_s24 }
 0x2f5   :  { %v820_v0 = vpop.permute.xlu1 %819 }
 0x2f6   :  { %v841_v56 = vsel %vm805_vm11, %v820_v0, %v777_v8 }
 0x2f7   :  { %v779_v53 = vpop.permute.xlu0 %778 }
 0x2f8   :  { %v806_v51 = vsel %vm805_vm11, %v1947_v33, %v779_v53  ;;  %v1116_v33 = vld [vmem:[%s2066_s6] ss:$0 sm:$0xff] }
 0x2f9   :  { %v824_v5 = vpop.permute.xlu1 %823 }
 0x2fa   :  { %v842_v10 = vsel %vm807_vm12, %v841_v56, %v824_v5  ;;  %v1117_v5 = vld [vmem:[%s2067_s7] ss:$0 sm:$0xff] }
 0x2fb   :  { %v783_v7 = vpop.permute.xlu0 %782 }
 0x2fc   :  { %v808_v49 = vsel %vm807_vm12, %v806_v51, %v783_v7 }
 0x2fd   :  { %v827_v58 = vpop.permute.xlu1 %826 }
 0x2fe   :  { %v843_v11 = vsel %vm809_vm13, %v842_v10, %v827_v58  ;;  %v1118_v58 = vld [vmem:[%s2068_s8] ss:$0 sm:$0xff] }
 0x2ff   :  { %v787_v52 = vpop.permute.xlu0 %786 }
 0x300   :  { %v810_v40 = vsel %vm809_vm13, %v808_v49, %v787_v52 }
 0x301   :  { %v830_v17 = vpop.permute.xlu1 %829 }
 0x302   :  { %v844_v3 = vsel %vm811_vm14, %v843_v11, %v830_v17 }
 0x303   :  { %v791_v4 = vpop.permute.xlu0 %790 }
 0x304   :  { %v812_v15 = vsel %vm811_vm14, %v810_v40, %v791_v4 }
 0x305   :  { %v833_v24 = vpop.permute.xlu1 %832 }
 0x306   :  { %v845_v12 = vsel %vm813_vm15, %v844_v3, %v833_v24 }
 0x307   :  { %v795_v63 = vpop.permute.xlu0 %794 }
 0x308   :  { %v814_v45 = vsel %vm813_vm15, %v812_v15, %v795_v63 }
 0x309   :  { %v836_v57 = vpop.permute.xlu1 %835 }
 0x30a   :  { %v846_v13 = vsel %vm815_vm0, %v845_v12, %v836_v57 }
 0x30b   :  { %v799_v14 = vpop.permute.xlu0 %798 }
 0x30c   :  { %v816_v19 = vsel %vm815_vm0, %v814_v45, %v799_v14 }
 0x30d   :  { %v839_v28 = vpop.permute.xlu1 %838 }
 0x30e   :  { %v847_v2 = vsel %vm817_vm1, %v846_v13, %v839_v28 }
 0x30f   :  { %v849_v18 = vrot.slane %v847_v2, 7 }
 0x311   :  { %v803_v54 = vpop.permute.xlu1 %802 }
 0x312   :  { %v818_v21 = vsel %vm817_vm1, %v816_v19, %v803_v54 }
 0x313   :  { %v852_v50 = vsel %vm851_vm2, %v818_v21, %v849_v18 }
 0x314   :  { %1250 = vmatmul.mubr.f32.vlgmr.msra.gmra.mrb[2].mxu0 %v852_v50  ;;  %853 = vst [vmem:[#allocation6] sm:$0x3] %v852_v50 }
 0x3e7   :  { %v943_v62 = vpop.f32.mrb[2].mxu0 }
 0x3e8   :  { %v944_v8 = vadd.f32 %v1116_v33, %v943_v62  ;;  %v1251_v61 = vpop.f32.mrb[3].mxu0 }
 0x3ea   :  { %v948_v34 = vsel %vm947_vm3, %v944_v8, 0.0 }
 0x3eb   :  { %v949_v20 = vrot.slane %v948_v34, 4 }
 0x3ed   :  { %v950_v35 = vadd.f32 %v949_v20, %v948_v34 }
 0x3ef   :  { %v951_v1 = vrot.slane %v950_v35, 2 }
 0x3f1   :  { %v952_v36 = vadd.f32 %v951_v1, %v950_v35 }
 0x3f3   :  { %v953_v37 = vrot.slane %v952_v36, 1 }
 0x3f5   :  { %v954_v38 = vadd.f32 %v953_v37, %v952_v36 }
 0x3f7   :  { %v956_v39 = vmul.f32 0.5, %v954_v38 }
 0x3f9   :  { %v957_v42 = vsub.f32 %v944_v8, %v956_v39 }
 0x3fb   :  { %v958_v43 = vmul.f32 %v957_v42, %v957_v42 }
 0x3fd   :  { %v959_v48 = vsel %vm947_vm3, %v958_v43, 0.0 }
 0x3fe   :  { %v960_v44 = vrot.slane %v959_v48, 4 }
 0x400   :  { %v961_v9 = vadd.f32 %v960_v44, %v959_v48 }
 0x402   :  { %v962_v46 = vrot.slane %v961_v9, 2 }
 0x404   :  { %v963_v47 = vadd.f32 %v962_v46, %v961_v9 }
 0x406   :  { %v964_v59 = vrot.slane %v963_v47, 1 }
 0x408   :  { %v965_v55 = vadd.f32 %v964_v59, %v963_v47 }
 0x40a   :  { %v966_v60 = vmul.f32 0.5, %v965_v55 }
 0x40c   :  { %v967_v0 = vadd.f32 1e-05, %v966_v60 }
 0x40e   :  { %1410 = vrsqrt.f32 %v967_v0 }
 0x418   :  { %v1411_v53 = vpop.eup %1410 }
 0x419   :  { %v969_v7 = vmul.f32 %v1411_v53, %v957_v42 }
 0x41b   :  { %v977_v52 = vmul.f32 %v1117_v5, %v969_v7 }
 0x41d   :  { %v985_v17 = vadd.f32 %v1118_v58, %v977_v52 }
 0x41f   :  { %v986_v4 = vmax.f32 %v985_v17, 0.0 }
 0x421   :  { %1269 = vmatmul.mubr.msk.f32.vlgmr.msra.gmra.mrb[6].mxu1 %vm811_vm14, %v986_v4 }
 0x422   :  { %1445 = shalt.err (!%p1442_p12)
}
 0x423   :  { %s1446_s24 = scalar_lea.hbm %s2072_s12, 32 }
 0x424   :  { %p1447_p13 = scmp.ne.s32.totalorder %s2072_s12, %s1446_s24  ;;  %p1450_p0 = scmp.lt.u32.totalorder %s1446_s24, %s2072_s12 }
 0x426   :  { %p1452_p1 = pnand %p1450_p0, %p1447_p13 }
 0x428   :  { %1455 = shalt.err (!%p1452_p1)
}
 0x429   :  { %1096 = dma.vmem_to_hbm [thread:$0]  %s1094_s19, 32, %s2072_s12, [#allocation7]   ;;  %v1119_v24 = vld [vmem:[%s2070_s10] ss:$0 sm:$0xff]  ;;  %vm1075_vm4 = vcmask 254976  }
 0x42a   :  { %s1505_s1 = smov [#allocation5]  }
 0x42b   :  { %s1083_s27 = sshll.u32 %s1505_s1, 4  ;;  %s1084_s27 = int_to_ptr.vmem [resolvable:$true] %s1083_s27 }
 0x42c   :  { %s1456_s28 = scalar_lea.vmem %s1084_s27, 32  ;;  %p1461_p3 = scmp.lt.s32.totalorder %s1084_s27, %s1084_s27 }
 0x42d   :  { %p1457_p2 = scmp.ne.s32.totalorder %s1084_s27, %s1456_s28  ;;  %p1462_p4 = scmp.lt.s32.totalorder %s1456_s28, %s1456_s28 }
 0x42f   :  { %p1463_p5 = por %p1462_p4, %p1461_p3 }
 0x431   :  { %p1464_p6 = pnand %p1463_p5, %p1457_p2 }
 0x4f4   :  { %v1071_v56 = vpop.f32.mrb[6].mxu1 }
 0x4f5   :  { %v1072_v63 = vadd.f32 %v1119_v24, %v1071_v56  ;;  %v1270_v10 = vpop.f32.mrb[7].mxu1 }
 0x4f7   :  { %1076 = vst.msk [vmem:[#allocation5] sm:$0x3] %vm1075_vm4, %v1072_v63 }
 0x4f8   :  { %1467 = shalt.err (!%p1464_p6)
}
 0x4f9   :  { %s1468_s20 = scalar_lea.hbm %s2071_s11, 32 }
 0x4fa   :  { %p1469_p7 = scmp.ne.s32.totalorder %s2071_s11, %s1468_s20  ;;  %p1472_p8 = scmp.lt.u32.totalorder %s1468_s20, %s2071_s11 }
 0x4fc   :  { %p1474_p9 = pnand %p1472_p8, %p1469_p7 }
 0x4fe   :  { %1477 = shalt.err (!%p1474_p9)
}
 0x4ff   :  { %1086 = dma.vmem_to_hbm [thread:$0]  %s1084_s27, 32, %s2071_s11, [#allocation4]  }
 0x500   :  { %1480 = dma.done.wait [#allocation4], 32  }
 0x501   :  { %1481 = vsyncadd [#allocation4], 4294967264 }
 0x502   :  { %1482 = dma.done.wait [#allocation7], 32  }
 0x503   :  { %1483 = vsyncadd [#allocation7], 4294967264 }
 0x504   :  { %1103 = vsyncpa [#allocation3], 1 }
 0x505   :  { %1104 = vsyncpa [#allocation4], 1 }
 0x506   :  { %1105 = vsyncpa [#allocation7], 1 }

</bundles_post_ra>
